<compile_context>
chip_gen: v5e
topology: v5e:2x2
jax: 0.10.0
libtpu: 0.0.40
codegen_flags: <defaults>
</compile_context>

<pallas_src>
import jax
import jax.numpy as jnp
from jax.experimental import pallas as pl
from jax.experimental.pallas import tpu as pltpu


def _round_up(x: int, m: int) -> int:
    return ((x + m - 1) // m) * m


def mlp_kernel(x_ref, w1_ref, b1_ref, w2_ref, b2_ref, o_ref):
    # x_ref : (TB, d_in)      bf16      w1_ref : (d_in, H_p)     bf16
    # b1_ref: (1, H_p)        f32       w2_ref : (H_p, D_out_p)  bf16
    # b2_ref: (1, D_out_p)    f32       o_ref  : (TB, D_out_p)   f32
    x = x_ref[...]
    # First matmul on the MXU with f32 accumulation; bias + ReLU in f32 (VPU).
    h = jnp.dot(x, w1_ref[...], preferred_element_type=jnp.float32) + b1_ref[...]
    h = jnp.maximum(h, 0.0)
    # Second matmul: cast activations to bf16 for MXU input rate, f32 epilogue.
    y = jnp.dot(h.astype(w2_ref.dtype), w2_ref[...],
                preferred_element_type=jnp.float32) + b2_ref[...]
    y = jnp.maximum(y, 0.0)
    o_ref[...] = y.astype(o_ref.dtype)


def prepare_params(w1, b1, w2, b2):
    """One-time padding / casting of the (tiny) weights, hoisted out of forward.

    w1:(d_in,H) b1:(1,H) or (H,)  w2:(H,d_out) b2:(1,d_out) or (d_out,).
    Only output-column dims are zero-padded to 128 (exact math); the K dim of
    w1 stays d_in so it matches the unpadded x.
    """
    d_in, hidden = w1.shape
    d_out = w2.shape[1]
    hidden_p = _round_up(hidden, 128)
    d_out_p = _round_up(d_out, 128)

    w1_p = jnp.zeros((d_in, hidden_p), jnp.bfloat16)
    w1_p = w1_p.at[:, :hidden].set(w1.astype(jnp.bfloat16))
    b1_p = jnp.zeros((1, hidden_p), jnp.float32)
    b1_p = b1_p.at[:, :hidden].set(jnp.reshape(b1, (1, hidden)).astype(jnp.float32))
    w2_p = jnp.zeros((hidden_p, d_out_p), jnp.bfloat16)
    w2_p = w2_p.at[:hidden, :d_out].set(w2.astype(jnp.bfloat16))
    b2_p = jnp.zeros((1, d_out_p), jnp.float32)
    b2_p = b2_p.at[:, :d_out].set(jnp.reshape(b2, (1, d_out)).astype(jnp.float32))
    return (w1_p, b1_p, w2_p, b2_p), d_out


def _choose_batch_tile(B: int, block_b: int) -> int:
    if B <= 32:
        # Single exact tile: block dims equal the full array dims, so the
        # (8,128)/(16,128) alignment rules don't apply. Safe for any tiny B.
        return B
    # Multiple of 16 (native bf16 sublane tile); at least 2 grid steps so the
    # "parallel" batch axis can be split across v7x's two TensorCores.
    return max(16, min(block_b, _round_up(pl.cdiv(B, 2), 16)))


def fasion_mnist_model_1_forward(x_nchw, prepared_params, d_out, *, block_b: int = 2048):
    """x_nchw: (B, C, H, W) float32. prepared_params from prepare_params().
    Returns (B, d_out) float32."""
    w1_p, b1_p, w2_p, b2_p = prepared_params
    B = x_nchw.shape[0]
    x_flat = x_nchw.reshape(B, -1).astype(jnp.bfloat16)   # nn.Flatten + bf16 MXU input
    d_in = x_flat.shape[1]
    assert d_in == w1_p.shape[0], (d_in, w1_p.shape)
    hidden_p = w1_p.shape[1]
    d_out_p = w2_p.shape[1]

    tb = _choose_batch_tile(B, block_b)
    grid_b = pl.cdiv(B, tb)          # ragged last block handled by Pallas

    cost = pl.CostEstimate(
        flops=2 * B * (d_in * hidden_p + hidden_p * d_out_p),
        transcendentals=0,
        bytes_accessed=(B * d_in * 2                      # x read (bf16)
                        + B * d_out_p * 4                 # out write (f32)
                        + d_in * hidden_p * 2             # w1 (bf16)
                        + hidden_p * d_out_p * 2          # w2 (bf16)
                        + 4 * (hidden_p + d_out_p)),      # biases (f32)
    )

    out_p = pl.pallas_call(
        mlp_kernel,
        out_shape=jax.ShapeDtypeStruct((B, d_out_p), jnp.float32),
        grid_spec=pl.GridSpec(
            grid=(grid_b,),
            in_specs=[
                pl.BlockSpec((tb, d_in), lambda i: (i, 0)),          # x tile per step
                pl.BlockSpec((d_in, hidden_p), lambda i: (0, 0)),    # weights VMEM-resident
                pl.BlockSpec((1, hidden_p), lambda i: (0, 0)),
                pl.BlockSpec((hidden_p, d_out_p), lambda i: (0, 0)),
                pl.BlockSpec((1, d_out_p), lambda i: (0, 0)),
            ],
            out_specs=pl.BlockSpec((tb, d_out_p), lambda i: (i, 0)),
        ),
        compiler_params=pltpu.CompilerParams(
            dimension_semantics=("parallel",),   # batch axis split across v7x's 2 TCs
        ),
        cost_estimate=cost,
    )(x_flat, w1_p, b1_p, w2_p, b2_p)

    # Drop the lane-padding columns (kept at 128 inside the kernel for unmasked vst).
    return out_p[:, :d_out]


def init_params(key, input_shape, hidden_units, output_shape):
    """Deterministic init mimicking nn.Linear default (uniform +-1/sqrt(fan_in)).
    Weights stored as (in, out), i.e. transpose of PyTorch's (out, in)."""
    k1, k2, k3, k4 = jax.random.split(key, 4)
    bound1 = 1.0 / jnp.sqrt(input_shape)
    bound2 = 1.0 / jnp.sqrt(hidden_units)
    w1 = jax.random.uniform(k1, (input_shape, hidden_units), jnp.float32, -bound1, bound1)
    b1 = jax.random.uniform(k2, (1, hidden_units), jnp.float32, -bound1, bound1)
    w2 = jax.random.uniform(k3, (hidden_units, output_shape), jnp.float32, -bound2, bound2)
    b2 = jax.random.uniform(k4, (1, output_shape), jnp.float32, -bound2, bound2)
    return w1, b1, w2, b2


if __name__ == "__main__":
    key = jax.random.PRNGKey(0)
    kx, kp = jax.random.split(key)

    # FashionMNIST-like, small: batch=8, 1 channel, 28x28 -> input_shape=784
    B, C, H, W = 8, 1, 28, 28
    input_shape = C * H * W
    hidden_units = 32
    output_shape = 10

    x = jax.random.normal(kx, (B, C, H, W), jnp.float32)
    w1, b1, w2, b2 = init_params(kp, input_shape, hidden_units, output_shape)

    prepared, d_out = prepare_params(w1, b1, w2, b2)   # one-time weight prep
    out = fasion_mnist_model_1_forward(x, prepared, d_out)
    out = jax.block_until_ready(out)
    assert out.shape == (B, output_shape)

    # Reference mirroring the kernel's bf16-input / f32-accumulate math.
    x_flat = x.reshape(B, -1)
    h_ref = jnp.maximum(
        x_flat.astype(jnp.bfloat16).astype(jnp.float32)
        @ w1.astype(jnp.bfloat16).astype(jnp.float32) + b1, 0.0)
    ref = jnp.maximum(
        h_ref.astype(jnp.bfloat16).astype(jnp.float32)
        @ w2.astype(jnp.bfloat16).astype(jnp.float32) + b2, 0.0)
    assert jnp.allclose(out, ref, atol=1e-2, rtol=1e-2), (
        float(jnp.max(jnp.abs(out - ref))))

    # Sanity vs full-f32 math (loose tolerance for bf16 quantization of inputs).
    ref_f32 = jnp.maximum(jnp.maximum(x_flat @ w1 + b1, 0.0) @ w2 + b2, 0.0)
    assert jnp.allclose(out, ref_f32, atol=5e-2, rtol=5e-2)

    print("KERNEL_OK")
</pallas_src>

<mosaic_0001>
module attributes {stable_mosaic.version = 11 : i64} {
  func.func @mlp_kernel(%arg0: i32, %arg1: memref<8x784xbf16, #tpu.memory_space<vmem>>, %arg2: memref<784x128xbf16, #tpu.memory_space<vmem>>, %arg3: memref<1x128xf32, #tpu.memory_space<vmem>>, %arg4: memref<128x128xbf16, #tpu.memory_space<vmem>>, %arg5: memref<1x128xf32, #tpu.memory_space<vmem>>, %arg6: memref<8x128xf32, #tpu.memory_space<vmem>>) attributes {dimension_semantics = [#tpu.dimension_semantics<parallel>], iteration_bounds = array<i64: 1>, scalar_prefetch = 0 : i64, scratch_operands = 0 : i64, tpu.core_type = #tpu.core_type<tc>, window_params = [{transform_indices = @transform_0, window_bounds = array<i64: 8, 784>}, {pipeline_mode = #tpu.pipeline_mode<synchronous>, transform_indices = @transform_1, window_bounds = array<i64: 784, 128>}, {pipeline_mode = #tpu.pipeline_mode<synchronous>, transform_indices = @transform_2, window_bounds = array<i64: 1, 128>}, {pipeline_mode = #tpu.pipeline_mode<synchronous>, transform_indices = @transform_3, window_bounds = array<i64: 128, 128>}, {pipeline_mode = #tpu.pipeline_mode<synchronous>, transform_indices = @transform_4, window_bounds = array<i64: 1, 128>}, {transform_indices = @transform_5, window_bounds = array<i64: 8, 128>}]} {
    %c0 = arith.constant 0 : index
    %c0_0 = arith.constant 0 : index
    %0 = vector.load %arg1[%c0, %c0_0] : memref<8x784xbf16, #tpu.memory_space<vmem>>, vector<8x784xbf16>
    %c0_1 = arith.constant 0 : index
    %c0_2 = arith.constant 0 : index
    %1 = vector.load %arg2[%c0_1, %c0_2] : memref<784x128xbf16, #tpu.memory_space<vmem>>, vector<784x128xbf16>
    %cst = arith.constant dense<0.000000e+00> : vector<8x128xf32>
    %2 = tpu.matmul %0, %1, %cst {dimension_numbers = #tpu.dot_dimension_numbers<[1], [0], [0], [1], [0, 0, 1, 1], [], []>} : vector<8x784xbf16>, vector<784x128xbf16>, vector<8x128xf32> -> vector<8x128xf32>
    %c0_3 = arith.constant 0 : index
    %c0_4 = arith.constant 0 : index
    %3 = vector.load %arg3[%c0_3, %c0_4] : memref<1x128xf32, #tpu.memory_space<vmem>>, vector<1x128xf32>
    %4 = vector.broadcast %3 : vector<1x128xf32> to vector<8x128xf32>
    %5 = arith.addf %2, %4 : vector<8x128xf32>
    %cst_5 = arith.constant 0.000000e+00 : f32
    %6 = vector.broadcast %cst_5 : f32 to vector<8x128xf32>
    %7 = arith.maximumf %5, %6 : vector<8x128xf32>
    %8 = arith.truncf %7 : vector<8x128xf32> to vector<8x128xbf16>
    %c0_6 = arith.constant 0 : index
    %c0_7 = arith.constant 0 : index
    %9 = vector.load %arg4[%c0_6, %c0_7] : memref<128x128xbf16, #tpu.memory_space<vmem>>, vector<128x128xbf16>
    %cst_8 = arith.constant dense<0.000000e+00> : vector<8x128xf32>
    %10 = tpu.matmul %8, %9, %cst_8 {dimension_numbers = #tpu.dot_dimension_numbers<[1], [0], [0], [1], [0, 0, 1, 1], [], []>} : vector<8x128xbf16>, vector<128x128xbf16>, vector<8x128xf32> -> vector<8x128xf32>
    %c0_9 = arith.constant 0 : index
    %c0_10 = arith.constant 0 : index
    %11 = vector.load %arg5[%c0_9, %c0_10] : memref<1x128xf32, #tpu.memory_space<vmem>>, vector<1x128xf32>
    %12 = vector.broadcast %11 : vector<1x128xf32> to vector<8x128xf32>
    %13 = arith.addf %10, %12 : vector<8x128xf32>
    %cst_11 = arith.constant 0.000000e+00 : f32
    %14 = vector.broadcast %cst_11 : f32 to vector<8x128xf32>
    %15 = arith.maximumf %13, %14 : vector<8x128xf32>
    %c0_12 = arith.constant 0 : index
    %c0_13 = arith.constant 0 : index
    %16 = vector.load %arg6[%c0_12, %c0_13] : memref<8x128xf32, #tpu.memory_space<vmem>>, vector<8x128xf32>
    tpu.vector_store %arg6[%c0_12, %c0_13], %15 {strides = array<i32>} : memref<8x128xf32, #tpu.memory_space<vmem>>, vector<8x128xf32>,
    return
  }
  func.func @transform_0(%arg0: i32) -> (i32, i32) {
    %c0_i32 = arith.constant 0 : i32
    %c0_i32_0 = arith.constant 0 : i32
    return %arg0, %c0_i32 : i32, i32
  }
  func.func @transform_1(%arg0: i32) -> (i32, i32) {
    %c0_i32 = arith.constant 0 : i32
    %c0_i32_0 = arith.constant 0 : i32
    %c0_i32_1 = arith.constant 0 : i32
    return %c0_i32, %c0_i32_0 : i32, i32
  }
  func.func @transform_2(%arg0: i32) -> (i32, i32) {
    %c0_i32 = arith.constant 0 : i32
    %c0_i32_0 = arith.constant 0 : i32
    %c0_i32_1 = arith.constant 0 : i32
    return %c0_i32, %c0_i32_0 : i32, i32
  }
  func.func @transform_3(%arg0: i32) -> (i32, i32) {
    %c0_i32 = arith.constant 0 : i32
    %c0_i32_0 = arith.constant 0 : i32
    %c0_i32_1 = arith.constant 0 : i32
    return %c0_i32, %c0_i32_0 : i32, i32
  }
  func.func @transform_4(%arg0: i32) -> (i32, i32) {
    %c0_i32 = arith.constant 0 : i32
    %c0_i32_0 = arith.constant 0 : i32
    %c0_i32_1 = arith.constant 0 : i32
    return %c0_i32, %c0_i32_0 : i32, i32
  }
  func.func @transform_5(%arg0: i32) -> (i32, i32) {
    %c0_i32 = arith.constant 0 : i32
    %c0_i32_0 = arith.constant 0 : i32
    return %arg0, %c0_i32 : i32, i32
  }
}

</mosaic_0001>

<bundles_post_ra>
// kernel: tpu_custom_call.1
= control target key start
LH: loop header
LB: loop body
LE: loop exit
PB: predicated region body
PF: predicated region fallthrough
CT: control target
= control target key end

     0   :  { %10 = vsyncpa [#allocation3], 0  ;;  %s1139_s0 = inlined_call_operand.hbm [shape: bf16[8,784], index: 0, kind: input, shape index: {}]   ;;  %s1140_s1 = inlined_call_operand.hbm [shape: bf16[784,128], index: 1, kind: input, shape index: {}]   ;;  %s1141_s2 = inlined_call_operand.vmem [shape: f32[1,128], index: 2, kind: input, shape index: {}]   ;;  %s1142_s3 = inlined_call_operand.hbm [shape: bf16[128,128], index: 3, kind: input, shape index: {}]   ;;  %s1143_s4 = inlined_call_operand.vmem [shape: f32[1,128], index: 4, kind: input, shape index: {}]   ;;  %s1144_s5 = inlined_call_operand.hbm [shape: f32[8,128], index: 5, kind: output, shape index: {}]  }
   0x1   :  { %11 = vsyncpa [#allocation6], 0  ;;  %s28_s20 = sshll.u32 %s1140_s1, 4  ;;  %s29_s20 = int_to_ptr.hbm [resolvable:$true] %s28_s20 }
   0x2   :  { %12 = vsyncpa [#allocation4], 0  ;;  %s1085_s21 = smov [#allocation5]   ;;  %s18_s25 = sshll.u32 %s1139_s0, 4  ;;  %s19_s25 = int_to_ptr.hbm [resolvable:$true] %s18_s25 }
   0x3   :  { %s30_s22 = sshll.u32 %s1085_s21, 4  ;;  %s1086_s26 = smov 64   ;;  %s31_s22 = int_to_ptr.vmem [resolvable:$true] %s30_s22 }
   0x4   :  { %s1087_s27 = smov 4   ;;  %s1088_s28 = smov [#allocation2]  }
   0x5   :  { %36 = dma.hbm_to_vmem [thread:$0]  %s29_s20, 6272, %s31_s22, [#allocation6], %s1086_s26, %s1086_s26, %s1087_s27  }
   0x6   :  { %s20_s29 = sshll.u32 %s1088_s28, 4  ;;  %s43_s7 = sshll.u32 %s1142_s3, 4  ;;  %s21_s29 = int_to_ptr.vmem [resolvable:$true] %s20_s29  ;;  %s44_s7 = int_to_ptr.hbm [resolvable:$true] %s43_s7 }
   0x7   :  { %23 = dma.hbm_to_vmem [thread:$0]  %s19_s25, 448, %s21_s29, [#allocation3]  }
   0x8   :  { %s1089_s1 = smov [#allocation7]  }
   0x9   :  { %s45_s8 = sshll.u32 %s1089_s1, 4  ;;  %s46_s8 = int_to_ptr.vmem [resolvable:$true] %s45_s8 }
   0xa   :  { %51 = dma.hbm_to_vmem [thread:$0]  %s44_s7, 1024, %s46_s8, [#allocation6], %s1086_s26, %s1086_s26, %s1087_s27  }
   0xb   :  { %1079 = dma.done.wait [#allocation3], 448  }
   0xc   :  { %1080 = vsyncadd [#allocation3], 4294966848 }
   0xd   :  { %1081 = dma.done.wait [#allocation6], 7296  }
   0xe   :  { %1082 = vsyncadd [#allocation6], 4294960000  ;;  %v925_v0 = vld [vmem:[#allocation5 + $0x38] sm:$0xff]  ;;  %v924_v3 = vld [vmem:[#allocation5 + $0x30] sm:$0xff]  ;;  %vm491_vm0 = vcmask 130048   ;;  %s1090_s10 = smov [#allocation8]  }
   0xf   :  { %v933_v1 = vld [vmem:[#allocation5 + $0x78] sm:$0xff]  ;;  %495 = vmatpush.bf16.msra.mxu0 %v925_v0  ;;  %v932_v4 = vld [vmem:[#allocation5 + $0x70] sm:$0xff]  ;;  %v923_v8 = vld [vmem:[#allocation5 + $0x28] sm:$0xff]  ;;  %s676_s11 = sshll.u32 %s1090_s10, 4  ;;  %s678_s14 = sshll.u32 %s1144_s5, 4  ;;  %s677_s11 = int_to_ptr.vmem [resolvable:$true] %s676_s11  ;;  %s679_s14 = int_to_ptr.hbm [resolvable:$true] %s678_s14 }
  0x10   :  { %v941_v2 = vld [vmem:[#allocation5 + $0xb8] sm:$0xff]  ;;  %508 = vmatpush.bf16.msra.mxu1 %v933_v1  ;;  %v940_v5 = vld [vmem:[#allocation5 + $0xb0] sm:$0xff]  ;;  %v931_v9 = vld [vmem:[#allocation5 + $0x68] sm:$0xff] }
  0x11   :  { %521 = vmatpush.bf16.msra.mxu2 %v941_v2  ;;  %v949_v6 = vld [vmem:[#allocation5 + $0xf8] sm:$0xff]  ;;  %v948_v7 = vld [vmem:[#allocation5 + $0xf0] sm:$0xff]  ;;  %v939_v10 = vld [vmem:[#allocation5 + $0xa8] sm:$0xff] }
  0x12   :  { %534 = vmatpush.bf16.msra.mxu3 %v949_v6  ;;  %v947_v11 = vld [vmem:[#allocation5 + $0xe8] sm:$0xff]  ;;  %v922_v12 = vld [vmem:[#allocation5 + $0x20] sm:$0xff]  ;;  %v921_v16 = vld [vmem:[#allocation5 + $0x18] sm:$0xff] }
  0x13   :  { %496 = vmatpush.bf16.msra.mxu0 %v924_v3  ;;  %v930_v13 = vld [vmem:[#allocation5 + $0x60] sm:$0xff]  ;;  %v929_v17 = vld [vmem:[#allocation5 + $0x58] sm:$0xff]  ;;  %v920_v20 = vld [vmem:[#allocation5 + $0x10] sm:$0xff] }
  0x14   :  { %509 = vmatpush.bf16.msra.mxu1 %v932_v4  ;;  %v938_v14 = vld [vmem:[#allocation5 + $0xa0] sm:$0xff]  ;;  %v937_v18 = vld [vmem:[#allocation5 + $0x98] sm:$0xff]  ;;  %v928_v21 = vld [vmem:[#allocation5 + $0x50] sm:$0xff] }
  0x15   :  { %522 = vmatpush.bf16.msra.mxu2 %v940_v5  ;;  %v946_v15 = vld [vmem:[#allocation5 + $0xe0] sm:$0xff]  ;;  %v945_v19 = vld [vmem:[#allocation5 + $0xd8] sm:$0xff]  ;;  %v936_v22 = vld [vmem:[#allocation5 + $0x90] sm:$0xff] }
  0x16   :  { %535 = vmatpush.bf16.msra.mxu3 %v948_v7  ;;  %v944_v23 = vld [vmem:[#allocation5 + $0xd0] sm:$0xff]  ;;  %v919_v24 = vld [vmem:[#allocation5 + $0x8] sm:$0xff]  ;;  %v918_v32 = vld [vmem:[#allocation5] sm:$0xff] }
  0x17   :  { %497 = vmatpush.bf16.msra.mxu0 %v923_v8  ;;  %v927_v25 = vld [vmem:[#allocation5 + $0x48] sm:$0xff]  ;;  %v926_v33 = vld [vmem:[#allocation5 + $0x40] sm:$0xff]  ;;  %v957_v34 = vld [vmem:[#allocation5 + $0x138] sm:$0xff] }
  0x18   :  { %510 = vmatpush.bf16.msra.mxu1 %v931_v9  ;;  %v67_v26 = vld [vmem:[#allocation2] sm:$0xff]  ;;  %v68_v28 = vld [vmem:[#allocation2 + $0x8] sm:$0xff]  ;;  %v965_v35 = vld [vmem:[#allocation5 + $0x178] sm:$0xff] }
  0x19   :  { %523 = vmatpush.bf16.msra.mxu2 %v939_v10  ;;  %v935_v27 = vld [vmem:[#allocation5 + $0x88] sm:$0xff]  ;;  %v177_v29 = vunpack.c.l.b16 %v67_v26  ;;  %v178_v31 = vunpack.c.h.b16 %v67_v26  ;;  %v934_v36 = vld [vmem:[#allocation5 + $0x80] sm:$0xff]  ;;  %v179_v37 = vunpack.c.l.b16 %v68_v28  ;;  %v180_v40 = vunpack.c.h.b16 %v68_v28  ;;  %v956_v43 = vld [vmem:[#allocation5 + $0x130] sm:$0xff] }
  0x1a   :  { %536 = vmatpush.bf16.msra.mxu3 %v947_v11  ;;  %v943_v30 = vld [vmem:[#allocation5 + $0xc8] sm:$0xff]  ;;  %v942_v41 = vld [vmem:[#allocation5 + $0xc0] sm:$0xff]  ;;  %v964_v44 = vld [vmem:[#allocation5 + $0x170] sm:$0xff] }
  0x1b   :  { %498 = vmatpush.bf16.msra.mxu0 %v922_v12  ;;  %v184_v38 = vpack.c.b16 %v177_v29, %v177_v29  ;;  %v185_v39 = vpack.c.b16 %v178_v31, %v178_v31  ;;  %v966_v42 = vld [vmem:[#allocation5 + $0x180] sm:$0xff]  ;;  %v186_v45 = vpack.c.b16 %v179_v37, %v179_v37  ;;  %v187_v46 = vpack.c.b16 %v180_v40, %v180_v40  ;;  %v955_v47 = vld [vmem:[#allocation5 + $0x128] sm:$0xff]  ;;  %v70_v51 = vld [vmem:[#allocation2 + $0x18] sm:$0xf] }
  0x1c   :  { %511 = vmatpush.bf16.msra.mxu1 %v930_v13  ;;  %v963_v48 = vld [vmem:[#allocation5 + $0x168] sm:$0xff]  ;;  %v954_v49 = vld [vmem:[#allocation5 + $0x120] sm:$0xff]  ;;  %v953_v52 = vld [vmem:[#allocation5 + $0x118] sm:$0xff]  ;;  %v183_v54 = vunpack.c.l.b16 %v70_v51 }
  0x1d   :  { %524 = vmatpush.bf16.msra.mxu2 %v938_v14  ;;  %v962_v50 = vld [vmem:[#allocation5 + $0x160] sm:$0xff]  ;;  %v961_v53 = vld [vmem:[#allocation5 + $0x158] sm:$0xff]  ;;  %v952_v55 = vld [vmem:[#allocation5 + $0x110] sm:$0xff] }
  0x1e   :  { %537 = vmatpush.bf16.msra.mxu3 %v946_v15  ;;  %v960_v56 = vld [vmem:[#allocation5 + $0x150] sm:$0xff]  ;;  %v190_v57 = vpack.c.b16 %v183_v54, %v183_v54  ;;  %v951_v58 = vld [vmem:[#allocation5 + $0x108] sm:$0xff]  ;;  %v950_v63 = vld [vmem:[#allocation5 + $0x100] sm:$0xff] }
  0x1f   :  { %499 = vmatpush.bf16.msra.mxu0 %v921_v16  ;;  %v959_v59 = vld [vmem:[#allocation5 + $0x148] sm:$0xff]  ;;  %v69_v60 = vld [vmem:[#allocation2 + $0x10] sm:$0xff]  ;;  %v958_v0 = vld [vmem:[#allocation5 + $0x140] sm:$0xff] }
  0x20   :  { %512 = vmatpush.bf16.msra.mxu1 %v929_v17  ;;  %v181_v61 = vunpack.c.l.b16 %v69_v60  ;;  %v182_v62 = vunpack.c.h.b16 %v69_v60  ;;  %v974_v3 = vld [vmem:[#allocation7 + $0x38] sm:$0xff]  ;;  %v973_v4 = vld [vmem:[#allocation7 + $0x30] sm:$0xff]  ;;  %v972_v5 = vld [vmem:[#allocation7 + $0x28] sm:$0xff] }
  0x21   :  { %525 = vmatpush.bf16.msra.mxu2 %v937_v18  ;;  %v971_v6 = vld [vmem:[#allocation7 + $0x20] sm:$0xff]  ;;  %v970_v7 = vld [vmem:[#allocation7 + $0x18] sm:$0xff]  ;;  %v969_v8 = vld [vmem:[#allocation7 + $0x10] sm:$0xff] }
  0x22   :  { %538 = vmatpush.bf16.msra.mxu3 %v945_v19  ;;  %v188_v1 = vpack.c.b16 %v181_v61, %v181_v61  ;;  %v189_v2 = vpack.c.b16 %v182_v62, %v182_v62  ;;  %v968_v9 = vld [vmem:[#allocation7 + $0x8] sm:$0xff]  ;;  %v967_v12 = vld [vmem:[#allocation7] sm:$0xff]  ;;  %v981_v17 = vld [vmem:[%s1141_s2] ss:$0 sm:$0xff] }
  0x23   :  { %500 = vmatpush.bf16.msra.mxu0 %v920_v20 }
  0x24   :  { %513 = vmatpush.bf16.msra.mxu1 %v928_v21 }
  0x25   :  { %526 = vmatpush.bf16.msra.mxu2 %v936_v22 }
  0x26   :  { %539 = vmatpush.bf16.msra.mxu3 %v944_v23 }
  0x27   :  { %501 = vmatpush.bf16.msra.mxu0 %v919_v24 }
  0x28   :  { %514 = vmatpush.bf16.msra.mxu1 %v927_v25 }
  0x29   :  { %527 = vmatpush.bf16.msra.mxu2 %v935_v27 }
  0x2a   :  { %540 = vmatpush.bf16.msra.mxu3 %v943_v30 }
  0x2b   :  { %502 = vmatpush.bf16.msra.mxu0 %v918_v32 }
  0x2c   :  { %515 = vmatpush.bf16.msra.mxu1 %v926_v33 }
  0x2d   :  { %528 = vmatpush.bf16.msra.mxu2 %v934_v36 }
  0x2e   :  { %503 = vmatmul.bf16.vlgmr.msra.gmra.mxu0 %v184_v38  ;;  %541 = vmatpush.bf16.msra.mxu3 %v942_v41 }
  0x2f   :  { %547 = vmatpush.bf16.msrb.mxu0 %v957_v34  ;;  %516 = vmatmul.bf16.vlgmr.msra.gmra.mxu1 %v185_v39 }
  0x30   :  { %560 = vmatpush.bf16.msrb.mxu1 %v965_v35  ;;  %529 = vmatmul.bf16.vlgmr.msra.gmra.mxu2 %v186_v45  ;;  %v982_v35 = vld [vmem:[%s1143_s4] ss:$0 sm:$0xff] }
  0x31   :  { %580 = vmatpush.bf16.msrb.mxu2 %v966_v42  ;;  %542 = vmatmul.bf16.vlgmr.msra.gmra.mxu3 %v187_v46 }
  0x32   :  { %656 = vmatpush.bf16.msrb.mxu3 %v974_v3 }
  0x33   :  { %548 = vmatpush.bf16.msrb.mxu0 %v956_v43 }
  0x34   :  { %561 = vmatpush.bf16.msrb.mxu1 %v964_v44 }
  0x36   :  { %657 = vmatpush.bf16.msrb.mxu3 %v973_v4 }
  0x37   :  { %549 = vmatpush.bf16.msrb.mxu0 %v955_v47 }
  0x38   :  { %562 = vmatpush.bf16.msrb.mxu1 %v963_v48 }
  0x3a   :  { %658 = vmatpush.bf16.msrb.mxu3 %v972_v5 }
  0x3b   :  { %550 = vmatpush.bf16.msrb.mxu0 %v954_v49 }
  0x3c   :  { %563 = vmatpush.bf16.msrb.mxu1 %v962_v50 }
  0x3e   :  { %659 = vmatpush.bf16.msrb.mxu3 %v971_v6 }
  0x3f   :  { %551 = vmatpush.bf16.msrb.mxu0 %v953_v52 }
  0x40   :  { %564 = vmatpush.bf16.msrb.mxu1 %v961_v53  ;;  %885 = vmatmul.msk.bf16.vlgmr.msrb.gmra.mxu2 %vm491_vm0, %v190_v57 }
  0x42   :  { %660 = vmatpush.bf16.msrb.mxu3 %v970_v7 }
  0x43   :  { %552 = vmatpush.bf16.msrb.mxu0 %v952_v55 }
  0x44   :  { %565 = vmatpush.bf16.msrb.mxu1 %v960_v56 }
  0x46   :  { %661 = vmatpush.bf16.msrb.mxu3 %v969_v8 }
  0x47   :  { %553 = vmatpush.bf16.msrb.mxu0 %v951_v58 }
  0x48   :  { %566 = vmatpush.bf16.msrb.mxu1 %v959_v59 }
  0x4a   :  { %662 = vmatpush.bf16.msrb.mxu3 %v968_v9 }
  0x4b   :  { %554 = vmatpush.bf16.msrb.mxu0 %v950_v63 }
  0x4c   :  { %567 = vmatpush.bf16.msrb.mxu1 %v958_v0 }
  0x4e   :  { %555 = vmatmul.bf16.vlgmr.msrb.gmra.mxu0 %v188_v1  ;;  %663 = vmatpush.bf16.msrb.mxu3 %v967_v12 }
  0x4f   :  { %568 = vmatmul.bf16.vlgmr.msrb.gmra.mxu1 %v189_v2 }
  0xab   :  { %v504_v10 = vpop.f32.mrf.mxu0 }
  0xac   :  { %v517_v11 = vpop.f32.mrf.mxu1  ;;  %v505_v18 = vadd.f32 %v981_v17, %v504_v10 }
  0xae   :  { %v518_v21 = vadd.f32 %v517_v11, %v505_v18 }
  0xb3   :  { %v506_v13 = vpop.f32.mrf.mxu0  ;;  %v530_v15 = vpop.f32.mrf.mxu2 }
  0xb4   :  { %v519_v14 = vpop.f32.mrf.mxu1  ;;  %v543_v16 = vpop.f32.mrf.mxu3  ;;  %v531_v22 = vadd.f32 %v530_v15, %v518_v21 }
  0xb6   :  { %v544_v24 = vadd.f32 %v543_v16, %v531_v22 }
  0xbb   :  { %v532_v19 = vpop.f32.mrf.mxu2 }
  0xbc   :  { %v545_v20 = vpop.f32.mrf.mxu3 }
  0xc3   :  { %v582_v23 = vpop.f32.mrf.mxu2 }
  0xcb   :  { %v556_v25 = vpop.f32.mrf.mxu0  ;;  %v584_v29 = vpop.f32.mrf.mxu2 }
  0xcc   :  { %v569_v26 = vpop.f32.mrf.mxu1  ;;  %v557_v27 = vadd.f32 %v556_v25, %v544_v24 }
  0xce   :  { %v570_v28 = vadd.f32 %v569_v26, %v557_v27 }
  0xd0   :  { %v583_v30 = vadd.f32 %v582_v23, %v570_v28 }
  0xd2   :  { %v586_v31 = vmax.f32 %v583_v30, 0.0 }
  0xd3   :  { %v558_v32 = vpop.f32.mrf.mxu0 }
  0xd4   :  { %v571_v33 = vpop.f32.mrf.mxu1  ;;  %v587_v34 = vpack.c.bf16 %v586_v31, %v586_v31 }
  0xd6   :  { %664 = vmatmul.bf16.vlgmr.msrb.gmra.mxu3 %v587_v34 }
 0x159   :  { %v665_v36 = vpop.f32.mrf.mxu3 }
 0x15a   :  { %v666_v37 = vadd.f32 %v982_v35, %v665_v36 }
 0x15c   :  { %v669_v38 = vmax.f32 %v666_v37, 0.0 }
 0x15e   :  { %670 = vst [vmem:[#allocation8] sm:$0xff] %v669_v38 }
 0x15f   :  { %681 = dma.vmem_to_hbm [thread:$0]  %s677_s11, 128, %s679_s14, [#allocation4]  }
 0x161   :  { %v667_v39 = vpop.f32.mrf.mxu3 }
 0x162   :  { %1083 = dma.done.wait [#allocation4], 128  }
 0x163   :  { %1084 = vsyncadd [#allocation4], 4294967168 }
 0x164   :  { %686 = vsyncpa [#allocation3], 1 }
 0x165   :  { %687 = vsyncpa [#allocation6], 1 }
 0x166   :  { %688 = vsyncpa [#allocation4], 1 }

</bundles_post_ra>
